<compile_context>
chip_gen: v7x
topology: tpu7x:2x2x1
jax: 0.10.0
libtpu: 0.0.40
codegen_flags: <defaults>
</compile_context>

<pallas_src>
import jax
import jax.numpy as jnp
import numpy as np
from jax.experimental import pallas as pl
from jax.experimental.pallas import tpu as pltpu


# ---------------------------------------------------------------------------
# Kernel
# ---------------------------------------------------------------------------
def _fourier_filter_kernel(k_ref, x_ref, var_ref, inv_ref):
    """Apply the precomputed time-axis filter K to a native-layout block.

    k_ref:   (L, L)       resident filter matrix (constant block index).
    x_ref:   (TB, L, TC)  input block, native (B, L, C) layout.
    var_ref: (TB, L, TC)  time-variant output  K @ x[b].
    inv_ref: (TB, L, TC)  time-invariant output x[b] - K @ x[b].
    """
    k = k_ref[...]

    def per_batch(b, carry):
        xb = x_ref[b]                                    # (L, TC)
        vb = jnp.dot(
            k, xb,
            preferred_element_type=jnp.float32,          # f32 accumulation on MXU
            precision=jax.lax.Precision.HIGHEST,         # exact f32 matmul path
        ).astype(xb.dtype)
        var_ref[b] = vb
        inv_ref[b] = xb - vb                             # residual on the VPU
        return carry

    jax.lax.fori_loop(0, x_ref.shape[0], per_batch, 0)


# ---------------------------------------------------------------------------
# Filter-matrix construction (factory time only — hoisted out of per-step path)
# ---------------------------------------------------------------------------
def _build_filter_matrix(seq_len: int, mask_spectrum: jnp.ndarray) -> jnp.ndarray:
    """K[m, n] such that x_var = K @ x reproduces irfft(mask * rfft(x), dim=time)."""
    n_freq = seq_len // 2 + 1
    mask = jnp.ones((n_freq,), jnp.float32).at[mask_spectrum].set(0.0)
    eye = jnp.eye(seq_len, dtype=jnp.float32)
    spec = jnp.fft.rfft(eye, axis=0)                            # (F, L) complex
    k = jnp.fft.irfft(mask[:, None] * spec, n=seq_len, axis=0)  # (L, L) real
    # NOTE: if L were not a multiple of 8, Mosaic pads the (full-extent) L dim
    # internally; K stays exact either way.
    return k.astype(jnp.float32)


# ---------------------------------------------------------------------------
# Tiling / VMEM budgeting
# ---------------------------------------------------------------------------
def _cdiv(a, b):
    return -(-a // b)


def _round_up(a, b):
    return _cdiv(a, b) * b


def _vmem_budget_and_limit():
    """Per-generation working-set budget + explicit scoped-VMEM limit."""
    try:
        cap = int(pltpu.get_tpu_info().vmem_capacity_bytes)
    except Exception:
        cap = 64 << 20                       # conservative fallback (v7x per-TC VMEM)
    budget = min(cap * 3 // 8, 48 << 20)     # block working set (v7x: 24 MiB, v5e/v6e: 48 MiB)
    limit = max(min(cap // 2, 64 << 20), budget + (8 << 20))   # + Mosaic scratch headroom
    return budget, limit


def _pick_tiles(B, L, C, itemsize, budget_bytes):
    """Choose (TB, TC) block sizes for native (B, L, C) tiling."""
    # K's block index is constant so it is DMA'd only once, but the pipeline
    # still allocates two buffers for it; charge 2x.
    # TODO(synk): single-buffer K (pipeline_mode=pl.Buffered(1)) to reclaim
    # L*L*itemsize of VMEM once that path is verified on all target jax versions.
    k_bytes = 2 * L * L * 4
    stream_budget = max(budget_bytes - k_bytes, 6 * L * 128 * itemsize)

    # Largest lane extent (multiple of 128) whose double-buffered x/var/inv
    # blocks fit the budget at TB == 1.
    max_block_lanes = max(128, (stream_budget // (6 * L * itemsize)) // 128 * 128)

    channel_tiling = (C > max_block_lanes) or (B == 1 and C >= 256)
    if not channel_tiling:
        # Keep the full channel dim per block (block == full dim, so no 128
        # alignment rule) and fold batch items to amortise per-step overhead.
        tc = C
        per_batch = 6 * L * C * itemsize
        tb = max(1, min(B, stream_budget // per_batch))
        if B >= 2:
            tb = min(tb, _cdiv(B, 2))        # >= 2 grid steps -> both v7x cores busy
        return int(tb), int(tc)

    # Large-C (or B == 1) path: tile channels in multiples of 128 lanes.
    tb = 1
    tc = max_block_lanes
    if B == 1:
        tc = min(tc, max(128, _round_up(_cdiv(C, 2), 128)))   # force >= 2 steps
    tc = min(tc, _round_up(C, 128))
    return int(tb), int(tc)


# ---------------------------------------------------------------------------
# pallas_call wrapper
# ---------------------------------------------------------------------------
def _fourier_filter_call(K, x, tb, tc, vmem_limit):
    B, L, C = x.shape
    itemsize = np.dtype(x.dtype).itemsize
    grid = (_cdiv(B, tb), _cdiv(C, tc))

    cost = pl.CostEstimate(
        flops=2 * B * L * L * C,
        transcendentals=0,
        bytes_accessed=L * L * 4 + 3 * B * L * C * itemsize,
    )

    grid_spec = pltpu.PrefetchScalarGridSpec(
        num_scalar_prefetch=0,
        grid=grid,
        in_specs=[
            pl.BlockSpec((L, L), lambda b, c: (0, 0)),           # K: constant block, DMA'd once
            pl.BlockSpec((tb, L, tc), lambda b, c: (b, 0, c)),   # x, native (B, L, C) layout
        ],
        out_specs=[
            pl.BlockSpec((tb, L, tc), lambda b, c: (b, 0, c)),   # x_var
            pl.BlockSpec((tb, L, tc), lambda b, c: (b, 0, c)),   # x_inv
        ],
    )

    return pl.pallas_call(
        _fourier_filter_kernel,
        out_shape=(
            jax.ShapeDtypeStruct((B, L, C), x.dtype),
            jax.ShapeDtypeStruct((B, L, C), x.dtype),
        ),
        grid_spec=grid_spec,
        compiler_params=pltpu.CompilerParams(
            dimension_semantics=("parallel", "parallel"),
            vmem_limit_bytes=int(vmem_limit),
        ),
        cost_estimate=cost,
    )(K, x)


def make_fourier_filter(seq_len: int, mask_spectrum: jnp.ndarray):
    """Build the filter operator once; returns a jitted (B, L, C) -> (x_var, x_inv)."""
    # K only changes with mask_spectrum: the two L x L FFTs run exactly once here.
    K = jax.device_put(_build_filter_matrix(seq_len, mask_spectrum))
    budget, vmem_limit = _vmem_budget_and_limit()

    @jax.jit
    def apply(x):
        B, L, C = x.shape
        assert L == seq_len, "seq_len mismatch with precomputed filter"
        tb, tc = _pick_tiles(B, L, C, np.dtype(x.dtype).itemsize, budget)
        return _fourier_filter_call(K, x, tb, tc, vmem_limit)

    return apply


# ---------------------------------------------------------------------------
# Reference + self-test
# ---------------------------------------------------------------------------
def _reference(x, mask_spectrum):
    B, L, C = x.shape
    xf = jnp.fft.rfft(x, axis=1)
    mask = jnp.ones_like(xf).at[:, mask_spectrum, :].set(0.0)
    x_var = jnp.fft.irfft(xf * mask, n=L, axis=1).astype(x.dtype)
    x_inv = x - x_var
    return x_var, x_inv


if __name__ == "__main__":
    key = jax.random.PRNGKey(0)
    B, L, C = 2, 16, 32
    x = jax.random.normal(key, (B, L, C), dtype=jnp.float32)

    # Deterministic "mask_spectrum" (frequencies to zero out), as the Koopa
    # module would receive from its amplitude-ranking step.
    mask_spectrum = jnp.array([0, 3], dtype=jnp.int32)

    fourier_filter = make_fourier_filter(L, mask_spectrum)   # K built & cached once
    x_var, x_inv = fourier_filter(x)
    jax.block_until_ready((x_var, x_inv))

    ref_var, ref_inv = _reference(x, mask_spectrum)
    assert jnp.allclose(x_var, ref_var, atol=1e-4, rtol=1e-4)
    assert jnp.allclose(x_inv, ref_inv, atol=1e-4, rtol=1e-4)
    assert jnp.allclose(x_var + x_inv, x, atol=1e-5)

    print("KERNEL_OK")
</pallas_src>

<mosaic_0001>
module attributes {stable_mosaic.version = 11 : i64} {
  func.func @_fourier_filter_kernel(%arg0: i32, %arg1: i32, %arg2: memref<16x16xf32, #tpu.memory_space<vmem>>, %arg3: memref<1x16x32xf32, #tpu.memory_space<vmem>>, %arg4: memref<1x16x32xf32, #tpu.memory_space<vmem>>, %arg5: memref<1x16x32xf32, #tpu.memory_space<vmem>>) attributes {dimension_semantics = [#tpu.dimension_semantics<parallel>, #tpu.dimension_semantics<parallel>], iteration_bounds = array<i64: 2, 1>, scalar_prefetch = 0 : i64, scratch_operands = 0 : i64, tpu.core_type = #tpu.core_type<tc>, window_params = [{pipeline_mode = #tpu.pipeline_mode<synchronous>, transform_indices = @transform_0, window_bounds = array<i64: 16, 16>}, {transform_indices = @transform_1, window_bounds = array<i64: 1, 16, 32>}, {transform_indices = @transform_2, window_bounds = array<i64: 1, 16, 32>}, {transform_indices = @transform_3, window_bounds = array<i64: 1, 16, 32>}]} {
    %c0 = arith.constant 0 : index
    %c0_0 = arith.constant 0 : index
    %0 = vector.load %arg2[%c0, %c0_0] : memref<16x16xf32, #tpu.memory_space<vmem>>, vector<16x16xf32>
    %c0_i32 = arith.constant 0 : i32
    %1 = arith.index_cast %c0_i32 : i32 to index
    %c0_1 = arith.constant 0 : index
    %c0_2 = arith.constant 0 : index
    %2 = vector.load %arg3[%1, %c0_1, %c0_2] : memref<1x16x32xf32, #tpu.memory_space<vmem>>, vector<1x16x32xf32>
    %3 = vector.shape_cast %2 : vector<1x16x32xf32> to vector<16x32xf32>
    %cst = arith.constant dense<0.000000e+00> : vector<16x32xf32>
    %4 = tpu.matmul %0, %3, %cst {dimension_numbers = #tpu.dot_dimension_numbers<[1], [0], [0], [1], [0, 0, 1, 1], [], []>, precision = #tpu.contract_precision<fp32>} : vector<16x16xf32>, vector<16x32xf32>, vector<16x32xf32> -> vector<16x32xf32>
    %5 = arith.index_cast %c0_i32 : i32 to index
    %c0_3 = arith.constant 0 : index
    %c0_4 = arith.constant 0 : index
    %6 = vector.load %arg4[%5, %c0_3, %c0_4] : memref<1x16x32xf32, #tpu.memory_space<vmem>>, vector<1x16x32xf32>
    %7 = vector.shape_cast %6 : vector<1x16x32xf32> to vector<16x32xf32>
    %8 = vector.shape_cast %4 : vector<16x32xf32> to vector<1x16x32xf32>
    tpu.vector_store %arg4[%5, %c0_3, %c0_4], %8 {strides = array<i32>} : memref<1x16x32xf32, #tpu.memory_space<vmem>>, vector<1x16x32xf32>,
    %9 = arith.subf %3, %4 : vector<16x32xf32>
    %10 = arith.index_cast %c0_i32 : i32 to index
    %c0_5 = arith.constant 0 : index
    %c0_6 = arith.constant 0 : index
    %11 = vector.load %arg5[%10, %c0_5, %c0_6] : memref<1x16x32xf32, #tpu.memory_space<vmem>>, vector<1x16x32xf32>
    %12 = vector.shape_cast %11 : vector<1x16x32xf32> to vector<16x32xf32>
    %13 = vector.shape_cast %9 : vector<16x32xf32> to vector<1x16x32xf32>
    tpu.vector_store %arg5[%10, %c0_5, %c0_6], %13 {strides = array<i32>} : memref<1x16x32xf32, #tpu.memory_space<vmem>>, vector<1x16x32xf32>,
    %c1_i32 = arith.constant 1 : i32
    return
  }
  func.func @transform_0(%arg0: i32, %arg1: i32) -> (i32, i32) {
    %c0_i32 = arith.constant 0 : i32
    %c0_i32_0 = arith.constant 0 : i32
    %c0_i32_1 = arith.constant 0 : i32
    return %c0_i32, %c0_i32_0 : i32, i32
  }
  func.func @transform_1(%arg0: i32, %arg1: i32) -> (i32, i32, i32) {
    %c0_i32 = arith.constant 0 : i32
    %c0_i32_0 = arith.constant 0 : i32
    return %arg0, %c0_i32, %arg1 : i32, i32, i32
  }
  func.func @transform_2(%arg0: i32, %arg1: i32) -> (i32, i32, i32) {
    %c0_i32 = arith.constant 0 : i32
    %c0_i32_0 = arith.constant 0 : i32
    return %arg0, %c0_i32, %arg1 : i32, i32, i32
  }
  func.func @transform_3(%arg0: i32, %arg1: i32) -> (i32, i32, i32) {
    %c0_i32 = arith.constant 0 : i32
    %c0_i32_0 = arith.constant 0 : i32
    return %arg0, %c0_i32, %arg1 : i32, i32, i32
  }
}

</mosaic_0001>

<bundles_post_ra>
// kernel: apply.1
= control target key start
LH: loop header
LB: loop body
LE: loop exit
PB: predicated region body
PF: predicated region fallthrough
CT: control target
= control target key end

     0   :  { %9 = vsyncpa [#allocation3], 0  ;;  %s1620_s0 = inlined_call_operand.hbm [shape: f32[16,16], index: 0, kind: input, shape index: {}]   ;;  %s1621_s1 = inlined_call_operand.hbm [shape: f32[2,16,32], index: 1, kind: input, shape index: {}]   ;;  %s1622_s2 = inlined_call_operand.hbm [shape: f32[2,16,32], index: 2, kind: output, shape index: {0}]   ;;  %s1623_s3 = inlined_call_operand.hbm [shape: f32[2,16,32], index: 3, kind: output, shape index: {1}]  }
   0x1   :  { %10 = vsyncpa [#allocation6], 0 }
   0x2   :  { %12 = vsyncpa [#allocation6 + $0x1], 0 }
   0x3   :  { %13 = vsyncpa [#allocation4], 0 }
   0x4   :  { %15 = vsyncpa [#allocation4 + $0x1], 0 }
   0x5   :  { %16 = vsyncpa [#allocation9], 0 }
   0x6   :  { %18 = vsyncpa [#allocation9 + $0x1], 0  ;;  %s1334_s12 = smov 0   ;;  %s1336_s13 = smov 0  }
   0x7   :  { %s1338_s14 = smov 0   ;;  %s1340_s15 = smov 0  }
   0x8   :  { %s1342_s16 = smov 0   ;;  %s1344_s17 = smov 0  }
   0x9 LB: > { %s922_s18 = sadd.s32 4294967295, %s1304_s17   ;;  %s923_s19 = sadd.s32 4294967294, %s1304_s17   ;;  %s1304_s17 = sphi %s1344_s17, %s24_s17   ;;  %s1300_s16 = sphi %s1342_s16, %s1647_s16   ;;  %s1296_s15 = sphi %s1340_s15, %s1646_s15   ;;  %s1292_s14 = sphi %s1338_s14, %s1645_s14   ;;  %s1288_s13 = sphi %s1336_s13, %s1644_s13   ;;  %s1284_s12 = sphi %s1334_s12, %s1643_s12  }
   0xa   : > { %p79_p0 = scmp.ne.s32.totalorder %s1288_s13, %s1284_s12  ;;  %p1368_p1 = scmp.eq.s32.totalorder %s922_s18, 0 }
   0xb   : > { %p1372_p2 = scmp.eq.s32.totalorder %s922_s18, 1  ;;  %p111_p3 = scmp.eq.s32.totalorder %s923_s19, 1 }
   0xc   : > { %s1628_s20 = scalar_select %p1368_p1, 1, 0 }
   0xd   : > { %s1629_s21 = scalar_select %p1372_p2, 1, 0 }
   0xe   : > { %p1378_p4 = por %p1368_p1, %p79_p0  ;;  %p924_p5 = scmp.ge.s32.totalorder %s1304_s17, 1 }
   0xf   : > { %p1383_p6 = por %p111_p3, %p79_p0  ;;  %p146_p7 = scmp.lt.s32.totalorder %s1304_s17, 3 }
  0x10   : > { %s1630_s22 = scalar_select %p1378_p4, 1, 0 }
  0x11   : > { %s1631_s23 = scalar_select %p1383_p6, 1, 0 }
  0x12   : > { %p1388_p8 = pnand %p924_p5, %p146_p7  ;;  %s1306_s25 = smov [#allocation2]  }
  0x13   : > { %s158_s26 = sshll.u32 %s1306_s25, 4  ;;  %s36_s28 = sadd.s32 1, %s1300_s16  ;;  %s159_s26 = int_to_ptr.vmem [resolvable:$true] %s158_s26 }
  0x14   : > { %s1632_s24 = scalar_select %p1388_p8, 1, 0 }
  0x15   : > { %p1056_p9 = pneg %p1388_p8  ;;  %s1128_s4 = scalar_lea.hbm %s1620_s0, 256 }
  0x16   : > { %p1129_p12 = scmp.ne.s32.totalorder %s1620_s0, %s1128_s4  ;;  %p1135_p5 = scmp.lt.u32.totalorder %s1128_s4, %s1620_s0 }
  0x17   : > { %p1397_p11 = pnand %p1056_p9, %p1368_p1 }
  0x19   : > { %p1130_p13 = pneg %p1397_p11 }
  0x1b   : > { %p1131_p0 = pnand %p1130_p13, %p1129_p12 }
  0x1d   : > { %p1132_p3 = pneg %p1131_p0 }
  0x1f   : > { %p1137_p7 = pnand %p1135_p5, %p1132_p3 }
  0x21   : > { %1140 = shalt.err (!%p1137_p7)
}
  0x22   : > { %s1141_s9 = scalar_lea.vmem %s159_s26, 256  ;;  %p1149_p4 = scmp.lt.s32.totalorder %s159_s26, %s159_s26 }
  0x23   : > { %p1142_p9 = scmp.ne.s32.totalorder %s159_s26, %s1141_s9  ;;  %p1150_p1 = scmp.lt.s32.totalorder %s1141_s9, %s1141_s9 }
  0x25   : > { %p1144_p10 = pnand %p1142_p9, %p1130_p13  ;;  %p1151_p8 = por %p1150_p1, %p1149_p4 }
  0x27   : > { %p1145_p6 = pneg %p1144_p10 }
  0x29   : > { %p1152_p2 = pnand %p1151_p8, %p1145_p6 }
  0x2b   : > { %1155 = shalt.err (!%p1152_p2)
}
  0x2c   : > { %s1307_s10 = smov 128   ;;  %s1308_s11 = smov 8  }
  0x2d   : > { %1059 = dma.hbm_to_vmem [thread:$0]  (!%p1397_p11), %s1620_s0, 256, %s159_s26, [#allocation3], %s1307_s10, %s1307_s10, %s1308_s11  }
  0x2e   : > { %p38_p1 = scmp.ge.s32.totalorder %s36_s28, 2  ;;  %s66_s25 = sadd.s32 1, %s1292_s14 }
  0x2f   : > { %p73_p2 = scmp.ne.s32.totalorder %s1292_s14, %s1288_s13  ;;  %p74_p4 = scmp.eq.s32.totalorder %s1304_s17, 0 }
  0x30   : > { %s1649_s28 = smov (%p38_p1, %s36_s28), 0  ;;  %p1635_p8 = scmp.ne.s32.totalorder %s1629_s21, 0 }
  0x31   : > { %p1427_p6 = por %p74_p4, %p73_p2  ;;  %s61_s30 = ssub.s32 %s1300_s16, %s1649_s28 }
  0x32   : > { %p1433_p10 = por %p1635_p8, %p73_p2  ;;  %p1072_p12 = scmp.lt.s32.totalorder %s1304_s17, 2 }
  0x33   : > { %p64_p11 = scmp.eq.s32.totalorder %s61_s30, 0  ;;  %s172_s26 = sand.u32 1, %s1292_s14  }
  0x34   : > { %s927_s4 = sshll.u32 %s172_s26, 4  ;;  %s943_s6 = sshll.u32 %s1300_s16, 8 }
  0x35   : > { %s1442_s5 = scalar_select %p64_p11, %s1292_s14, %s66_s25  }
  0x36   : > { %s1448_s9 = scalar_lea.hbm %s1621_s1, %s943_s6  ;;  %s176_s21 = scalar_lea.vmem [#allocation5], %s927_s4 }
  0x37   : > { %s184_s18 = sshll.u32 %s176_s21, 4  ;;  %p1454_p13 = pnand %p1072_p12, %p1427_p6  ;;  %s1450_s18 = int_to_ptr.vmem [resolvable:$true] %s184_s18 }
  0x38   : > { %s1458_s25 = scalar_lea.sflag [#allocation6], %s172_s26  ;;  %s1156_s30 = scalar_lea.hbm %s1448_s9, 256 }
  0x39   : > { %p1157_p0 = scmp.ne.s32.totalorder %s1448_s9, %s1156_s30  ;;  %p1158_p3 = pneg %p1454_p13 }
  0x3a   : > { %s1161_s29 = scalar_lea.hbm %s1621_s1, 512  ;;  %p1162_p9 = scmp.lt.u32.totalorder %s1448_s9, %s1621_s1 }
  0x3b   : > { %p1159_p5 = pnand %p1158_p3, %p1157_p0  ;;  %p1163_p1 = scmp.lt.u32.totalorder %s1161_s29, %s1156_s30 }
  0x3c   : > { %p1165_p4 = scmp.lt.u32.totalorder %s1156_s30, %s1448_s9 }
  0x3d   : > { %p1160_p7 = pneg %p1159_p5  ;;  %p1164_p2 = por %p1163_p1, %p1162_p9 }
  0x3f   : > { %p1166_p6 = por %p1165_p4, %p1164_p2 }
  0x41   : > { %p1167_p8 = pnand %p1166_p6, %p1160_p7 }
  0x43   : > { %1170 = shalt.err (!%p1167_p8)
}
  0x44   : > { %s1171_s26 = scalar_lea.vmem %s1450_s18, 256  ;;  %s1309_s21 = smov [#allocation5]  }
  0x45   : > { %p1172_p12 = scmp.ne.s32.totalorder %s1450_s18, %s1171_s26  ;;  %s1176_s4 = sshll.u32 %s1309_s21, 4  ;;  %s1177_s4 = int_to_ptr.vmem [resolvable:$false] %s1176_s4 }
  0x46   : > { %s1178_s6 = scalar_lea.vmem %s1177_s4, 512  ;;  %p1179_p5 = scmp.lt.s32.totalorder %s1450_s18, %s1177_s4 }
  0x47   : > { %p1174_p11 = pnand %p1172_p12, %p1158_p3  ;;  %p1180_p9 = scmp.lt.s32.totalorder %s1178_s6, %s1171_s26 }
  0x49   : > { %p1175_p0 = pneg %p1174_p11  ;;  %p1181_p1 = por %p1180_p9, %p1179_p5 }
  0x4b   : > { %p1182_p2 = pnand %p1181_p1, %p1175_p0 }
  0x4d   : > { %1185 = shalt.err (!%p1182_p2)
}
  0x4e   : > { %1063 = dma.hbm_to_vmem [thread:$0]  (!%p1454_p13), %s1448_s9, 256, %s1450_s18, %s1458_s25, %s1307_s10, %s1307_s10, %s1308_s11  }
  0x4f   : > { %p1638_p3 = scmp.ne.s32.totalorder %s1632_s24, 0 }
  0x50   : > { %p1639_p7 = scmp.ne.s32.totalorder (!%p1638_p3), %s1628_s20, 0 }
  0x51   : > { %196 = sbr.rel (%p1638_p3) target bundleno = 377 (0x179), region = 28 }
  0x58   : > { %1267 = dma.done.wait (%p1639_p7), [#allocation3], 256  }
  0x59   : > { %1269 = vsyncadd (%p1639_p7), [#allocation3], 4294967040  ;;  %s1496_s30 = sand.u32 1, %s1288_s13   ;;  %p1640_p13 = scmp.ne.s32.totalorder %s1630_s22, 0 }
  0x5a   : > { %s1499_s19 = sshll.u32 %s1496_s30, 4  ;;  %s203_s29 = scalar_lea.sflag [#allocation6], %s1496_s30 }
  0x5b   : > { %s206_s10 = scalar_lea.vmem [#allocation5], %s1499_s19 }
  0x5c   : > { %1271 = dma.done.wait (%p1640_p13), %s203_s29, 256  }
  0x5d   : > { %1273 = vsyncadd (%p1640_p13), %s203_s29, 4294967040  ;;  %vm238_vm0 = vcmask 130048   ;;  %v1507_v0 = vld [vmem:[%s206_s10] sm:$0xff]  ;;  %v1509_v1 = vld [vmem:[%s206_s10 + $0x8] sm:$0xff]  ;;  %s226_s20 = scalar_lea.vmem [#allocation7], %s1499_s19  ;;  %s944_s24 = sshll.u32 %s1296_s15, 8 }
  0x5e   : > { %v234_v2 = vld [vmem:[#allocation2] sm:$0xff]  ;;  %v246_v3 = vand.u32 4294901760, %v1507_v0  ;;  %v249_v4 = vand.u32 4294901760, %v1509_v1  ;;  %v235_v5 = vld [vmem:[#allocation2 + $0x8] sm:$0xff]  ;;  %s774_s22 = sshll.u32 %s226_s20, 4  ;;  %vm747_vm1 = vcmask 261120   ;;  %s1522_s18 = scalar_lea.hbm %s1622_s2, %s944_s24  ;;  %s1517_s22 = int_to_ptr.vmem [resolvable:$true] %s774_s22 }
  0x5f   : > { %v240_v6 = vsel %vm238_vm0, %v234_v2, 0  ;;  %v243_v7 = vsel %vm238_vm0, %v235_v5, 0  ;;  %s1525_s25 = scalar_lea.vmem [#allocation8], %s1499_s19  ;;  %s1535_s26 = scalar_lea.hbm %s1623_s3, %s944_s24 }
  0x60   : > { %v312_v8 = vand.u32 4294901760, %v240_v6  ;;  %v1012_v9 = vpack.c.bf16 %v249_v4, %v246_v3  ;;  %v322_v10 = vand.u32 4294901760, %v243_v7  ;;  %v334_v11 = vsub.f32 %v1507_v0, %v246_v3  ;;  %s791_s15 = sshll.u32 %s1525_s25, 4  ;;  %s755_s21 = scalar_lea.sflag [#allocation4], %s1496_s30  ;;  %s1537_s15 = int_to_ptr.vmem [resolvable:$true] %s791_s15 }
  0x61   : > { %v341_v12 = vsub.f32 %v1509_v1, %v249_v4  ;;  %s1186_s4 = scalar_lea.vmem %s1517_s22, 256  ;;  %s1310_s6 = smov [#allocation7]  }
  0x62   : > { %v313_v13 = vsub.f32 %v240_v6, %v312_v8  ;;  %1025 = vmatprep.subr.bf16.mxu0 %v1012_v9  ;;  %1013 = vmatprep.subr.bf16.mxu1 %v1012_v9  ;;  %v323_v14 = vsub.f32 %v243_v7, %v322_v10  ;;  %v335_v15 = vand.u32 4294901760, %v334_v11  ;;  %p1187_p4 = scmp.ne.s32.totalorder %s1517_s22, %s1186_s4  ;;  %s1190_s19 = sshll.u32 %s1310_s6, 4  ;;  %s1191_s19 = int_to_ptr.vmem [resolvable:$false] %s1190_s19 }
  0x63   : > { %v342_v16 = vand.u32 4294901760, %v341_v12  ;;  %1027 = vmatpush3.bf16.msra.mxu0 %v1012_v9  ;;  %1015 = vmatpush3.bf16.msra.mxu1 %v1012_v9  ;;  %v1020_v29 = vpack.c.bf16 %v341_v12, %v334_v11  ;;  %s1192_s29 = scalar_lea.vmem %s1191_s19, 512  ;;  %p1193_p12 = scmp.lt.s32.totalorder %s1517_s22, %s1191_s19 }
  0x64   : > { %v314_v17 = vand.u32 4294901760, %v313_v13  ;;  %v324_v18 = vand.u32 4294901760, %v323_v14  ;;  %v336_v19 = vsub.f32 %v334_v11, %v335_v15  ;;  %p1188_p6 = pnand %p1187_p4, %p1433_p10  ;;  %p1194_p11 = scmp.lt.s32.totalorder %s1192_s29, %s1186_s4 }
  0x65   : > { %v343_v20 = vsub.f32 %v341_v12, %v342_v16  ;;  %v1028_v21 = vpack.c.bf16 %v342_v16, %v335_v15 }
  0x66   : > { %995 = vmatprep.mubr.f32.mxu0 %v314_v17  ;;  %v315_v22 = vsub.f32 %v313_v13, %v314_v17  ;;  %v325_v23 = vsub.f32 %v323_v14, %v324_v18  ;;  %v337_v24 = vand.u32 4294901760, %v336_v19  ;;  %p1189_p8 = pneg %p1188_p6  ;;  %p1195_p0 = por %p1194_p11, %p1193_p12 }
  0x67   : > { %996 = vmatmul.mubr.f32.vlgmr.msra.gmra.mrb[0].mxu0 %v324_v18  ;;  %v344_v25 = vand.u32 4294901760, %v343_v20  ;;  %1029 = vmatprep.subr.bf16.mxu0 %v1028_v21 }
  0x68   : > { %v316_v26 = vand.u32 4294901760, %v315_v22  ;;  %1031 = vmatpush3.bf16.msra.mxu0 %v1028_v21  ;;  %1002 = vmatprep.mubr.f32.mxu0 %v312_v8  ;;  %v326_v27 = vand.u32 4294901760, %v325_v23  ;;  %p1196_p5 = pnand %p1195_p0, %p1189_p8 }
  0x69   : > { %v1016_v28 = vpack.c.bf16 %v344_v25, %v337_v24  ;;  %1033 = vmatprep.subr.bf16.mxu0 %v1012_v9 }
  0x6a   : > { %974 = vmatprep.mubr.f32.mxu1 %v316_v26 }
  0x6b   : > { %975 = vmatmul.mubr.f32.vlgmr.msra.gmra.mrb[0].mxu1 %v326_v27  ;;  %1017 = vmatprep.subr.bf16.mxu1 %v1016_v28 }
  0x6c   : > { %1019 = vmatpush3.bf16.msra.mxu1 %v1016_v28  ;;  %981 = vmatprep.mubr.f32.mxu1 %v312_v8 }
  0x6d   : > { %1021 = vmatprep.subr.bf16.mxu1 %v1020_v29 }
  0x6f   : > { %1003 = vmatmul.mubr.f32.vlgmr.msra.gmra.mrb[0].mxu0 %v322_v10 }
  0x70   : > { %1035 = vmatpush3.bf16.msra.mxu0 %v1012_v9  ;;  %1009 = vmatprep.mubr.f32.mxu0 %v312_v8 }
  0x73   : > { %982 = vmatmul.mubr.f32.vlgmr.msra.gmra.mrb[0].mxu1 %v322_v10 }
  0x74   : > { %1023 = vmatpush3.bf16.msra.mxu1 %v1020_v29  ;;  %988 = vmatprep.mubr.f32.mxu1 %v313_v13 }
  0x77   : > { %1010 = vmatmul.mubr.f32.vlgmr.msra.gmra.mrb[0].mxu0 %v322_v10 }
  0x7b   : > { %989 = vmatmul.mubr.f32.vlgmr.msra.gmra.mrb[0].mxu1 %v323_v14 }
 0x14a   : > { %v1011_v30 = vpop.f32.mrb[0].mxu0 }
 0x14b   : > { %v737_v31 = vpop.f32.mrb[1].mxu0 }
 0x14e   : > { %v990_v32 = vpop.f32.mrb[0].mxu1 }
 0x14f   : > { %v1036_v33 = vadd.f32 %v1011_v30, %v990_v32  ;;  %v491_v34 = vpop.f32.mrb[1].mxu1 }
 0x150   : > { %v1037_v35 = vadd.f32 %v737_v31, %v491_v34 }
 0x151   : > { %749 = vst.msk [vmem:[%s226_s20 + $0x8] sm:$0xff] %vm747_vm1, %v1036_v33  ;;  %v751_v36 = vsub.f32 %v1509_v1, %v1036_v33 }
 0x152   : > { %748 = vst.msk [vmem:[%s226_s20] sm:$0xff] %vm747_vm1, %v1037_v35  ;;  %v750_v37 = vsub.f32 %v1507_v0, %v1037_v35 }
 0x153   : > { %753 = vst.msk [vmem:[%s1525_s25 + $0x8] sm:$0xff] %vm747_vm1, %v751_v36 }
 0x154   : > { %1199 = shalt.err (!%p1196_p5)
}
 0x155   : > { %s1200_s10 = scalar_lea.hbm %s1522_s18, 256  ;;  %s1204_s11 = scalar_lea.hbm %s1622_s2, 512 }
 0x156   : > { %p1201_p9 = scmp.ne.s32.totalorder %s1522_s18, %s1200_s10  ;;  %p1205_p3 = scmp.lt.u32.totalorder %s1522_s18, %s1622_s2 }
 0x157   : > { %p1206_p7 = scmp.lt.u32.totalorder %s1204_s11, %s1200_s10  ;;  %p1208_p4 = scmp.lt.u32.totalorder %s1200_s10, %s1522_s18 }
 0x158   : > { %p1202_p1 = pnand %p1201_p9, %p1433_p10 }
 0x159   : > { %p1207_p13 = por %p1206_p7, %p1205_p3 }
 0x15a   : > { %p1203_p2 = pneg %p1202_p1 }
 0x15b   : > { %p1209_p6 = por %p1208_p4, %p1207_p13 }
 0x15d   : > { %p1210_p8 = pnand %p1209_p6, %p1203_p2 }
 0x15f   : > { %1213 = shalt.err (!%p1210_p8)
}
 0x160   : > { %s1311_s8 = smov 128   ;;  %s1312_s4 = smov 8   ;;  %752 = vst.msk [vmem:[%s1525_s25] sm:$0xff] %vm747_vm1, %v750_v37 }
 0x161   : > { %1052 = dma.vmem_to_hbm [thread:$0]  (%p1433_p10), %s1517_s22, 256, %s1522_s18, %s755_s21, %s1311_s8, %s1311_s8, %s1312_s4  }
 0x162   : > { %s760_s6 = scalar_lea.sflag [#allocation9], %s1496_s30  ;;  %s1214_s19 = scalar_lea.vmem %s1537_s15, 256 }
 0x163   : > { %p1215_p12 = scmp.ne.s32.totalorder %s1537_s15, %s1214_s19  ;;  %s1313_s29 = smov [#allocation8]  }
 0x164   : > { %s1218_s10 = sshll.u32 %s1313_s29, 4  ;;  %s1219_s10 = int_to_ptr.vmem [resolvable:$false] %s1218_s10 }
 0x165   : > { %p1216_p11 = pnand %p1215_p12, %p1433_p10  ;;  %s1220_s20 = scalar_lea.vmem %s1219_s10, 512 }
 0x166   : > { %p1221_p5 = scmp.lt.s32.totalorder %s1537_s15, %s1219_s10  ;;  %p1222_p9 = scmp.lt.s32.totalorder %s1220_s20, %s1214_s19 }
 0x167   : > { %p1217_p0 = pneg %p1216_p11 }
 0x168   : > { %p1223_p1 = por %p1222_p9, %p1221_p5 }
 0x16a   : > { %p1224_p2 = pnand %p1223_p1, %p1217_p0 }
 0x16c   : > { %1227 = shalt.err (!%p1224_p2)
}
 0x16d   : > { %s1228_s22 = scalar_lea.hbm %s1535_s26, 256  ;;  %s1232_s21 = scalar_lea.hbm %s1623_s3, 512 }
 0x16e   : > { %p1229_p3 = scmp.ne.s32.totalorder %s1535_s26, %s1228_s22  ;;  %p1233_p4 = scmp.lt.u32.totalorder %s1535_s26, %s1623_s3 }
 0x16f   : > { %p1234_p6 = scmp.lt.u32.totalorder %s1232_s21, %s1228_s22  ;;  %p1236_p12 = scmp.lt.u32.totalorder %s1228_s22, %s1535_s26 }
 0x170   : > { %p1230_p7 = pnand %p1229_p3, %p1433_p10 }
 0x171   : > { %p1235_p8 = por %p1234_p6, %p1233_p4 }
 0x172   : > { %p1231_p13 = pneg %p1230_p7 }
 0x173   : > { %p1237_p11 = por %p1236_p12, %p1235_p8 }
 0x175   : > { %p1238_p0 = pnand %p1237_p11, %p1231_p13 }
 0x177   : > { %1241 = shalt.err (!%p1238_p0)
}
 0x178   : > { %1053 = dma.vmem_to_hbm [thread:$0]  (%p1433_p10), %s1537_s15, 256, %s1535_s26, %s760_s6, %s1311_s8, %s1311_s8, %s1312_s4  }
 0x179 PF: > { %s806_s9 = sand.u32 1, %s1284_s12   ;;  %p1641_p5 = scmp.ne.s32.totalorder %s1631_s23, 0 }
 0x17a   : > { %p1642_p9 = scmp.ge.s32.totalorder %s1304_s17, 2  ;;  %s807_s7 = scalar_lea.sflag [#allocation4], %s806_s9 }
 0x17c   : > { %p1065_p1 = pnand %p1642_p9, %p1641_p5 }
 0x17e   : > { %1275 = dma.done.wait (!%p1065_p1), %s807_s7, 256  }
 0x17f   : > { %1277 = vsyncadd (!%p1065_p1), %s807_s7, 4294967040  ;;  %s816_s27 = scalar_lea.sflag [#allocation9], %s806_s9 }
 0x180   : > { %1279 = dma.done.wait (!%p1065_p1), %s816_s27, 256  }
 0x181   : > { %1281 = vsyncadd (!%p1065_p1), %s816_s27, 4294967040  ;;  %s24_s17 = sadd.s32 1, %s1304_s17   ;;  %s1643_s12 = smov %s1288_s13 }
 0x182   : > { %p21_p2 = scmp.ge.s32.totalorder %s24_s17, 4   ;;  %s1644_s13 = smov %s1292_s14 }
 0x183   : > { %s1645_s14 = smov %s1442_s5  ;;  %s1646_s15 = smov %s1300_s16 }
 0x184   : > { %s1647_s16 = smov %s1649_s28  ;;  %23 = sbr.rel (!%p21_p2) target bundleno = 9 (0x9), region = 95 }
 0x18b   :  { %821 = vsyncpa [#allocation3], 1 }
 0x18c   :  { %823 = vsyncpa [#allocation3 + $0x1], 1 }
 0x18d   :  { %824 = vsyncpa [#allocation6], 1 }
 0x18e   :  { %826 = vsyncpa [#allocation6 + $0x1], 1 }
 0x18f   :  { %827 = vsyncpa [#allocation4], 1 }
 0x190   :  { %829 = vsyncpa [#allocation4 + $0x1], 1 }
 0x191   :  { %830 = vsyncpa [#allocation9], 1 }
 0x192   :  { %832 = vsyncpa [#allocation9 + $0x1], 1 }

</bundles_post_ra>
